<compile_context>
chip_gen: v7x
topology: tpu7x:2x2x1
jax: 0.10.0
libtpu: 0.0.40
codegen_flags: <defaults>
</compile_context>

<pallas_src>
from functools import partial

import jax
import jax.numpy as jnp
from jax.experimental import pallas as pl
from jax.experimental.pallas import tpu as pltpu


_MAX_TILE_ELEMS = 32768  # bounds the unrolled lane-fold (<=64 adds of 512 lanes)


def _choose_tile_params(hw, c, itemsize):
    """Pick a lane-dense spatial tile (bytes-based, per TPU generation)."""
    try:
        vmem_cap = pltpu.get_tpu_info().vmem_capacity_bytes
    except Exception:
        vmem_cap = 64 * 1024 * 1024  # unknown -> size conservatively (v7x-like)

    if vmem_cap >= 96 * 1024 * 1024:      # v5e / v6e: 128 MiB VMEM
        per_block = 12 * 1024 * 1024
        vmem_limit = 64 * 1024 * 1024
    else:                                  # v7x: 64 MiB VMEM per TensorCore
        per_block = 6 * 1024 * 1024
        vmem_limit = 32 * 1024 * 1024

    cap = per_block // (c * itemsize)
    cap = (cap // 128) * 128
    cap = max(cap, 128)
    cap = min(cap, _MAX_TILE_ELEMS)
    ts = hw if hw <= cap else cap          # full axis is always legal
    return ts, vmem_limit


def _acc_lane_width(ts):
    if ts % 512 == 0:
        return 512
    if ts % 128 == 0:
        return 128
    return ts


def _make_pool_kernel(*, ts, hw, t_total, t_per_split, acc_lanes, needs_mask):
    """Pass 1: per-(batch, split) spatial sum into a lane-dense accumulator."""

    def _fold(xv):
        # Fold a (C, TS) slab into (C, acc_lanes) with static lane slices:
        # pure elementwise VPU adds, no XLU, no relayout.
        out = xv[:, 0:acc_lanes]
        for j in range(1, ts // acc_lanes):
            out = out + xv[:, j * acc_lanes:(j + 1) * acc_lanes]
        return out

    def kernel(x_ref, part_ref, acc_ref):
        s = pl.program_id(1)
        t = pl.program_id(2)

        @pl.when(t == 0)
        def _():
            acc_ref[...] = jnp.zeros_like(acc_ref)

        x = x_ref[0].astype(jnp.float32)          # (C, TS)

        if needs_mask:
            t_global = s * t_per_split + t
            is_last_global = t_global == t_total - 1

            @pl.when(jnp.logical_not(is_last_global))
            def _():                               # steady state: no mask
                acc_ref[...] += _fold(x)

            @pl.when(is_last_global)
            def _():                               # tail tile only
                lane = jax.lax.broadcasted_iota(jnp.int32, x.shape, 1)
                xm = jnp.where(t_global * ts + lane < hw, x, 0.0)
                acc_ref[...] += _fold(xm)
        else:
            acc_ref[...] += _fold(x)

        @pl.when(t == pl.num_programs(2) - 1)
        def _():
            # Single cross-lane reduction, once per (batch, split).
            part_ref[0, 0] = jnp.sum(acc_ref[...], axis=-1, keepdims=True)

    return kernel


def _broadcast_kernel(att_ref, o_ref):
    """Pass 2: expand_as — lane-dense broadcast store of att over H*W."""
    c, ts = o_ref.shape[1], o_ref.shape[2]
    o_ref[0] = jnp.broadcast_to(att_ref[0], (c, ts)).astype(o_ref.dtype)


@partial(jax.jit, static_argnames=("k_size",))
def channel_attention(x, conv_weight, k_size=3):
    """x: (B, C, H, W); conv_weight: (k_size,) Conv1d taps (flattened)."""
    B, C, H, W = x.shape
    HW = H * W
    pad = (k_size - 1) // 2
    inv_hw = 1.0 / float(HW)
    itemsize = jnp.dtype(x.dtype).itemsize

    x2 = x.reshape(B, C, HW)                       # free NCHW view, lane-dense

    TS, vmem_limit = _choose_tile_params(HW, C, itemsize)
    T = pl.cdiv(HW, TS)
    needs_mask = (HW % TS) != 0
    acc_lanes = _acc_lane_width(TS)

    # Spatial split axis: gives a second "parallel" grid axis so both v7x
    # TensorCores work on the reduction even at batch 1 (partial sums are
    # combined in XLA below). Only used when it divides the tile count.
    if T >= 2 and T % 2 == 0:
        NS, T2 = 2, T // 2
    else:
        NS, T2 = 1, T

    # ---- Pass 1: tiled spatial sum -> (B, NS, C, 1) partial sums -----------
    partial_sums = pl.pallas_call(
        _make_pool_kernel(ts=TS, hw=HW, t_total=T, t_per_split=T2,
                          acc_lanes=acc_lanes, needs_mask=needs_mask),
        out_shape=jax.ShapeDtypeStruct((B, NS, C, 1), jnp.float32),
        grid_spec=pltpu.PrefetchScalarGridSpec(
            num_scalar_prefetch=0,
            grid=(B, NS, T2),
            in_specs=[pl.BlockSpec((1, C, TS),
                                   lambda b, s, t: (b, 0, s * T2 + t))],
            out_specs=pl.BlockSpec((1, 1, C, 1), lambda b, s, t: (b, s, 0, 0)),
            scratch_shapes=[pltpu.VMEM((C, acc_lanes), jnp.float32)],
        ),
        compiler_params=pltpu.CompilerParams(
            dimension_semantics=("parallel", "parallel", "arbitrary"),
            vmem_limit_bytes=vmem_limit,
        ),
        cost_estimate=pl.CostEstimate(
            flops=int(B * C * HW),
            transcendentals=0,
            bytes_accessed=int(B * C * HW * itemsize + B * NS * C * 4),
        ),
    )(x2)

    # ---- Tiny (B, C) channel conv + sigmoid in XLA (per perf review) -------
    pooled = jnp.sum(partial_sums, axis=1)[..., 0] * inv_hw        # (B, C)
    pp = jnp.pad(pooled, ((0, 0), (pad, pad)))
    y = sum(conv_weight[i] * pp[:, i:i + C] for i in range(k_size))
    att = jax.nn.sigmoid(y)                                        # (B, C)

    # ---- Pass 2: broadcast att over the flattened spatial axis -------------
    out2 = pl.pallas_call(
        _broadcast_kernel,
        out_shape=jax.ShapeDtypeStruct((B, C, HW), x.dtype),
        grid_spec=pltpu.PrefetchScalarGridSpec(
            num_scalar_prefetch=0,
            grid=(B, T),
            in_specs=[pl.BlockSpec((1, C, 1), lambda b, t: (b, 0, 0))],
            out_specs=pl.BlockSpec((1, C, TS), lambda b, t: (b, 0, t)),
        ),
        compiler_params=pltpu.CompilerParams(
            dimension_semantics=("parallel", "parallel"),
            vmem_limit_bytes=vmem_limit,
        ),
        cost_estimate=pl.CostEstimate(
            flops=0,
            transcendentals=0,
            bytes_accessed=int(B * C * 4 + B * C * HW * itemsize),
        ),
    )(att[:, :, None].astype(jnp.float32))

    return out2.reshape(B, C, H, W)


def _reference(x, conv_weight, k_size=3):
    """Pure-JAX reference mirroring the PyTorch forward."""
    B, C, H, W = x.shape
    pad = (k_size - 1) // 2
    pooled = jnp.mean(x, axis=(2, 3))                 # (B, C)
    pp = jnp.pad(pooled, ((0, 0), (pad, pad)))
    y = sum(conv_weight[i] * pp[:, i:i + C] for i in range(k_size))
    att = jax.nn.sigmoid(y)
    return jnp.broadcast_to(att[:, :, None, None], (B, C, H, W))


if __name__ == "__main__":
    key = jax.random.PRNGKey(0)
    kx, kw = jax.random.split(key)

    B, C, H, W = 2, 4, 16, 16
    k_size = 3

    x = jax.random.normal(kx, (B, C, H, W), dtype=jnp.float32)
    # Conv1d(1, 1, k_size, bias=False) weight (flattened), PyTorch-style
    # uniform init in [-1/sqrt(k), 1/sqrt(k)].
    bound = 1.0 / (k_size ** 0.5)
    conv_weight = jax.random.uniform(
        kw, (k_size,), dtype=jnp.float32, minval=-bound, maxval=bound
    )

    out = channel_attention(x, conv_weight, k_size=k_size)
    out = jax.block_until_ready(out)

    ref = _reference(x, conv_weight, k_size=k_size)
    assert out.shape == x.shape
    assert jnp.allclose(out, ref, atol=1e-5, rtol=1e-5)

    print("KERNEL_OK")
</pallas_src>

<mosaic_0001>
module attributes {stable_mosaic.version = 11 : i64} {
  func.func @kernel(%arg0: i32, %arg1: i32, %arg2: i32, %arg3: memref<1x4x256xf32, #tpu.memory_space<vmem>>, %arg4: memref<1x1x4x1xf32, #tpu.memory_space<vmem>>, %arg5: memref<4x128xf32, #tpu.memory_space<vmem>>) attributes {dimension_semantics = [#tpu.dimension_semantics<parallel>, #tpu.dimension_semantics<parallel>, #tpu.dimension_semantics<arbitrary>], iteration_bounds = array<i64: 2, 1, 1>, scalar_prefetch = 0 : i64, scratch_operands = 1 : i64, tpu.core_type = #tpu.core_type<tc>, window_params = [{transform_indices = @transform_0, window_bounds = array<i64: 1, 4, 256>}, {transform_indices = @transform_1, window_bounds = array<i64: 1, 1, 4, 1>}]} {
    %c0_i32 = arith.constant 0 : i32
    %0 = arith.cmpi eq, %arg2, %c0_i32 : i32
    %1 = arith.extui %0 : i1 to i32
    %c0_i32_0 = arith.constant 0 : i32
    %2 = arith.cmpi ne, %1, %c0_i32_0 : i32
    scf.if %2 {
      %cst = arith.constant 0.000000e+00 : f32
      %14 = vector.broadcast %cst : f32 to vector<4x128xf32>
      %c0_9 = arith.constant 0 : index
      %c0_10 = arith.constant 0 : index
      %15 = vector.load %arg5[%c0_9, %c0_10] : memref<4x128xf32, #tpu.memory_space<vmem>>, vector<4x128xf32>
      tpu.vector_store %arg5[%c0_9, %c0_10], %14 {strides = array<i32>} : memref<4x128xf32, #tpu.memory_space<vmem>>, vector<4x128xf32>,
    } else {
    }
    %c0 = arith.constant 0 : index
    %c0_1 = arith.constant 0 : index
    %c0_2 = arith.constant 0 : index
    %3 = vector.load %arg3[%c0, %c0_1, %c0_2] : memref<1x4x256xf32, #tpu.memory_space<vmem>>, vector<1x4x256xf32>
    %4 = vector.shape_cast %3 : vector<1x4x256xf32> to vector<4x256xf32>
    %c0_3 = arith.constant 0 : index
    %c0_4 = arith.constant 0 : index
    %5 = vector.load %arg5[%c0_3, %c0_4] : memref<4x128xf32, #tpu.memory_space<vmem>>, vector<4x128xf32>
    %6 = vector.extract_strided_slice %4 {offsets = [0, 0], sizes = [4, 128], strides = [1, 1]} : vector<4x256xf32> to vector<4x128xf32>
    %7 = vector.extract_strided_slice %4 {offsets = [0, 128], sizes = [4, 128], strides = [1, 1]} : vector<4x256xf32> to vector<4x128xf32>
    %8 = arith.addf %6, %7 : vector<4x128xf32>
    %9 = arith.addf %5, %8 : vector<4x128xf32>
    %c0_5 = arith.constant 0 : index
    %c0_6 = arith.constant 0 : index
    %10 = vector.load %arg5[%c0_5, %c0_6] : memref<4x128xf32, #tpu.memory_space<vmem>>, vector<4x128xf32>
    tpu.vector_store %arg5[%c0_5, %c0_6], %9 {strides = array<i32>} : memref<4x128xf32, #tpu.memory_space<vmem>>, vector<4x128xf32>,
    %c0_i32_7 = arith.constant 0 : i32
    %11 = arith.cmpi eq, %arg2, %c0_i32_7 : i32
    %12 = arith.extui %11 : i1 to i32
    %c0_i32_8 = arith.constant 0 : i32
    %13 = arith.cmpi ne, %12, %c0_i32_8 : i32
    scf.if %13 {
      %c0_9 = arith.constant 0 : index
      %c0_10 = arith.constant 0 : index
      %14 = vector.load %arg5[%c0_9, %c0_10] : memref<4x128xf32, #tpu.memory_space<vmem>>, vector<4x128xf32>
      %cst = arith.constant dense<0.000000e+00> : vector<4xf32>
      %15 = vector.multi_reduction <add>, %14, %cst [1] : vector<4x128xf32> to vector<4xf32>
      %16 = vector.shape_cast %15 : vector<4xf32> to vector<4x1xf32>
      %c0_11 = arith.constant 0 : index
      %c0_12 = arith.constant 0 : index
      %c0_13 = arith.constant 0 : index
      %c0_14 = arith.constant 0 : index
      %17 = vector.load %arg4[%c0_11, %c0_12, %c0_13, %c0_14] : memref<1x1x4x1xf32, #tpu.memory_space<vmem>>, vector<1x1x4x1xf32>
      %18 = vector.shape_cast %17 : vector<1x1x4x1xf32> to vector<4x1xf32>
      %19 = vector.shape_cast %16 : vector<4x1xf32> to vector<1x1x4x1xf32>
      tpu.vector_store %arg4[%c0_11, %c0_12, %c0_13, %c0_14], %19 {strides = array<i32>} : memref<1x1x4x1xf32, #tpu.memory_space<vmem>>, vector<1x1x4x1xf32>,
    } else {
    }
    return
  }
  func.func @transform_0(%arg0: i32, %arg1: i32, %arg2: i32) -> (i32, i32, i32) {
    %c1_i32 = arith.constant 1 : i32
    %0 = arith.muli %arg1, %c1_i32 : i32
    %1 = arith.addi %0, %arg2 : i32
    %c0_i32 = arith.constant 0 : i32
    %c0_i32_0 = arith.constant 0 : i32
    return %arg0, %c0_i32, %1 : i32, i32, i32
  }
  func.func @transform_1(%arg0: i32, %arg1: i32, %arg2: i32) -> (i32, i32, i32, i32) {
    %c0_i32 = arith.constant 0 : i32
    %c0_i32_0 = arith.constant 0 : i32
    %c0_i32_1 = arith.constant 0 : i32
    return %arg0, %arg1, %c0_i32, %c0_i32_0 : i32, i32, i32, i32
  }
}

module attributes {stable_mosaic.version = 11 : i64} {
  func.func @_broadcast_kernel(%arg0: i32, %arg1: i32, %arg2: memref<1x4x1xf32, #tpu.memory_space<vmem>>, %arg3: memref<1x4x256xf32, #tpu.memory_space<vmem>>) attributes {dimension_semantics = [#tpu.dimension_semantics<parallel>, #tpu.dimension_semantics<parallel>], iteration_bounds = array<i64: 2, 1>, scalar_prefetch = 0 : i64, scratch_operands = 0 : i64, tpu.core_type = #tpu.core_type<tc>, window_params = [{transform_indices = @transform_0, window_bounds = array<i64: 1, 4, 1>}, {transform_indices = @transform_1, window_bounds = array<i64: 1, 4, 256>}]} {
    %c0 = arith.constant 0 : index
    %c0_0 = arith.constant 0 : index
    %c0_1 = arith.constant 0 : index
    %0 = vector.load %arg2[%c0, %c0_0, %c0_1] : memref<1x4x1xf32, #tpu.memory_space<vmem>>, vector<1x4x1xf32>
    %1 = vector.shape_cast %0 : vector<1x4x1xf32> to vector<4x1xf32>
    %2 = vector.shape_cast %1 : vector<4x1xf32> to vector<4x1xf32>
    %3 = vector.broadcast %2 : vector<4x1xf32> to vector<4x256xf32>
    %c0_2 = arith.constant 0 : index
    %c0_3 = arith.constant 0 : index
    %c0_4 = arith.constant 0 : index
    %4 = vector.load %arg3[%c0_2, %c0_3, %c0_4] : memref<1x4x256xf32, #tpu.memory_space<vmem>>, vector<1x4x256xf32>
    %5 = vector.shape_cast %4 : vector<1x4x256xf32> to vector<4x256xf32>
    %6 = vector.shape_cast %3 : vector<4x256xf32> to vector<1x4x256xf32>
    tpu.vector_store %arg3[%c0_2, %c0_3, %c0_4], %6 {strides = array<i32>} : memref<1x4x256xf32, #tpu.memory_space<vmem>>, vector<1x4x256xf32>,
    return
  }
  func.func @transform_0(%arg0: i32, %arg1: i32) -> (i32, i32, i32) {
    %c0_i32 = arith.constant 0 : i32
    %c0_i32_0 = arith.constant 0 : i32
    %c0_i32_1 = arith.constant 0 : i32
    return %arg0, %c0_i32, %c0_i32_0 : i32, i32, i32
  }
  func.func @transform_1(%arg0: i32, %arg1: i32) -> (i32, i32, i32) {
    %c0_i32 = arith.constant 0 : i32
    %c0_i32_0 = arith.constant 0 : i32
    return %arg0, %c0_i32, %arg1 : i32, i32, i32
  }
}

</mosaic_0001>

<bundles_post_ra>
// kernel: channel_attention.3
= control target key start
LH: loop header
LB: loop body
LE: loop exit
PB: predicated region body
PF: predicated region fallthrough
CT: control target
= control target key end

     0   :  { %s306_s6 = smov 0   ;;  %s308_s7 = smov 0   ;;  %s336_s0 = inlined_call_operand.vmem [shape: f32[2,4,1], index: 0, kind: input, shape index: {}]   ;;  %s337_s1 = inlined_call_operand.vmem [shape: f32[2,4,256], index: 1, kind: output, shape index: {}]  }
   0x1   :  { %s310_s8 = smov 0  }
   0x2 LB: > { %s23_s9 = sadd.s32 1, %s288_s7  ;;  %p236_p0 = scmp.ge.s32.totalorder %s292_s8, 1  ;;  %s292_s8 = sphi %s310_s8, %s11_s8   ;;  %s288_s7 = sphi %s308_s7, %s339_s7   ;;  %s284_s6 = sphi %s306_s6, %s338_s6  }
   0x3   : > { %p25_p1 = scmp.ge.s32.totalorder %s23_s9, 2  ;;  %p100_p2 = scmp.lt.s32.totalorder %s292_s8, 3 }
   0x5   : > { %s341_s9 = smov (%p25_p1, %s23_s9), 0  ;;  %p101_p3 = pnand %p236_p0, %p100_p2 }
   0x6   : > { %p123_p4 = scmp.lt.s32.totalorder (!%p101_p3), %s284_s6, 1  ;;  %v294_v0 = vmov (!%p101_p3), 0   ;;  %v295_v2 = vmov (!%p101_p3), 839922192   ;;  %v145_v4 = vlaneseq (!%p101_p3) }
   0x7   : > { %104 = sbr.rel (%p101_p3) target bundleno = 149 (0x95), region = 24  ;;  %269 = vset.pattern.permute.xlu0 (!%p101_p3), %v294_v0  ;;  %v143_v3 = vunpack.c.l.s4 (!%p101_p3), %v295_v2 }
   0x8   : > { %v146_v6 = vshrl.u32 (!%p101_p3), %v145_v4, 7 }
   0x9   : > { %v144_v5 = vunpack.c.0.s8 (!%p101_p3), %v143_v3 }
   0xb   : > { %v147_v7 = vsub.s32 (!%p101_p3), %v144_v5, %v146_v6 }
   0xe   : > { %s343_s6 = smov (!%p123_p4, %s284_s6), 1 }
   0xf   : > { %s237_s10 = sshll.u32 %s343_s6, 2  ;;  %s242_s14 = sshll.u32 %s343_s6, 3 }
  0x10   : > { %s126_s13 = scalar_lea.vmem %s336_s0, %s237_s10  ;;  %s135_s17 = scalar_lea.vmem %s337_s1, %s242_s14 }
  0x11   : > { %v137_v1 = vld [vmem:[%s126_s13] sm:$0xf] }
  0x12   : > { %140 = vperm.xlu0 %269, %v137_v1  }
  0x91   : > { %v141_v8 = vpop.permute.xlu0 %140 }
  0x92   : > { %v148_v9 = vrot.slane %v141_v8, %v147_v7 }
  0x94   : > { %150 = vst [vmem:[%s135_s17] sm:$0xff] %v148_v9 }
  0x95 PF: > { %s11_s8 = sadd.s32 1, %s292_s8   ;;  %s338_s6 = smov %s288_s7 }
  0x96   : > { %p8_p5 = scmp.ge.s32.totalorder %s11_s8, 4   ;;  %s339_s7 = smov %s341_s9 }
  0x98   :  { %10 = sbr.rel (!%p8_p5) target bundleno = 2 (0x2), region = 54 }

// kernel: channel_attention.2
= control target key start
LH: loop header
LB: loop body
LE: loop exit
PB: predicated region body
PF: predicated region fallthrough
CT: control target
= control target key end

     0   :  { %s339_s6 = smov 0   ;;  %s341_s7 = smov 0   ;;  %s369_s0 = inlined_call_operand.vmem [shape: f32[2,4,256], index: 0, kind: input, shape index: {}]   ;;  %s370_s1 = inlined_call_operand.vmem [shape: f32[2,1,4,1], index: 1, kind: output, shape index: {}]  }
   0x1   :  { %s343_s8 = smov 0  }
   0x2 LB: > { %s30_s9 = sadd.s32 1, %s322_s7  ;;  %p272_p0 = scmp.ge.s32.totalorder %s326_s8, 1  ;;  %s326_s8 = sphi %s343_s8, %s11_s8   ;;  %s322_s7 = sphi %s341_s7, %s372_s7   ;;  %s318_s6 = sphi %s339_s6, %s371_s6  }
   0x3   : > { %p32_p1 = scmp.ge.s32.totalorder %s30_s9, 2  ;;  %p119_p2 = scmp.lt.s32.totalorder %s326_s8, 3 }
   0x5   : > { %s374_s9 = smov (%p32_p1, %s30_s9), 0  ;;  %p120_p3 = pnand %p272_p0, %p119_p2 }
   0x6   : > { %p148_p4 = scmp.lt.s32.totalorder (!%p120_p3), %s318_s6, 1  ;;  %v328_v0 = vmov (!%p120_p3), 0.0   ;;  %vm182_vm0 = vcmask (!%p120_p3), 1043456   ;;  %vm186_vm1 = vcmask (!%p120_p3), 3072  }
   0x7   : > { %123 = sbr.rel (%p120_p3) target bundleno = 176 (0xb0), region = 24  ;;  %169 = vst [vmem:[#allocation2] sm:$0xf] (!%p120_p3), %v328_v0 }
   0xe   : > { %s376_s6 = smov (!%p148_p4, %s318_s6), 1  ;;  %v171_v3 = vld [vmem:[#allocation2] sm:$0xf] }
   0xf   : > { %s278_s10 = sshll.u32 %s376_s6, 3  ;;  %s275_s14 = sshll.u32 %s376_s6, 2 }
  0x10   : > { %s155_s13 = scalar_lea.vmem %s369_s0, %s278_s10  ;;  %s164_s17 = scalar_lea.vmem %s370_s1, %s275_s14 }
  0x11   : > { %v170_v1 = vld [vmem:[%s155_s13] sm:$0xff] }
  0x12   : > { %v173_v2 = vrot.slane %v170_v1, 4 }
  0x14   : > { %v175_v4 = vadd.f32 %v173_v2, %v170_v1 }
  0x16   : > { %v176_v5 = vadd.f32 %v175_v4, %v171_v3 }
  0x18   : > { %177 = vst [vmem:[#allocation2] sm:$0xf] %v176_v5 }
  0x1f   : > { %v181_v6 = vld [vmem:[#allocation2] sm:$0xf] }
  0x20   : > { %v183_v7 = vsel %vm182_vm0, %v181_v6, 0.0 }
  0x21   : > { %184 = vadd.xlane.f32.xlu0 %v183_v7 }
  0xae   : > { %v185_v8 = vpop.xlane.xlu0 %184 }
  0xaf   : > { %187 = vst.msk [vmem:[%s164_s17] sm:$0xf] %vm186_vm1, %v185_v8 }
  0xb0 PF: > { %s11_s8 = sadd.s32 1, %s326_s8   ;;  %s371_s6 = smov %s322_s7 }
  0xb1   : > { %p8_p5 = scmp.ge.s32.totalorder %s11_s8, 4   ;;  %s372_s7 = smov %s374_s9 }
  0xb3   :  { %10 = sbr.rel (!%p8_p5) target bundleno = 2 (0x2), region = 62 }

</bundles_post_ra>
